<compile_context>
chip_gen: v7x
topology: tpu7x:2x2x1
jax: 0.10.0
libtpu: 0.0.40
codegen_flags: <defaults>
</compile_context>

<pallas_src>
import jax
import jax.numpy as jnp
from jax import lax
from jax.experimental import pallas as pl
from jax.experimental.pallas import tpu as pltpu


def gcn_fused_kernel(adj_ref, x_ref, w_ref, bias_ref, wlin_ref, out_ref, flat_ref):
    BN_rows, F = x_ref.shape              # (B*N, F)
    B, C = out_ref.shape
    N = BN_rows // B

    adj = adj_ref[...]                    # (B*N, B*N) block-diag D^-1/2 A D^-1/2
    bias = bias_ref[...]                  # (3, F): rows = b1, b2, (blin + folded beta)
    w1 = w_ref[0:F, :]                    # (F, F)
    w2 = w_ref[F:2 * F, :]                # (F, F)
    b1 = bias[0:1, :]
    b2 = bias[1:2, :]
    blin = bias[2:3, 0:C]                 # (1, C)

    # GraphConv #1: Â X W1 + b1, then ReLU. Dropout in eval mode == identity.
    # TODO(synk): training-mode dropout mask not modeled.
    agg1 = jnp.dot(adj, x_ref[...], preferred_element_type=jnp.float32)        # (B*N, F)
    h1 = jnp.maximum(jnp.dot(agg1, w1, preferred_element_type=jnp.float32) + b1, 0.0)

    # GraphConv #2: Â h1 W2 + b2.
    agg2 = jnp.dot(adj, h1, preferred_element_type=jnp.float32)                # (B*N, F)
    h2 = jnp.dot(agg2, w2, preferred_element_type=jnp.float32) + b2            # (B*N, F)

    # BatchNorm1d over the feature channel (training-mode batch statistics over all
    # B*N node positions). One-pass stats: var = E[x^2] - mean^2 (two independent
    # reductions instead of two serialized ones). gamma/beta are folded into wlin/blin.
    inv_n = 1.0 / BN_rows
    mean = jnp.sum(h2, axis=0, keepdims=True) * inv_n                          # (1, F)
    ex2 = jnp.sum(h2 * h2, axis=0, keepdims=True) * inv_n                      # (1, F)
    var = ex2 - mean * mean
    hn = (h2 - mean) * lax.rsqrt(var + 1e-5)                                   # (B*N, F)

    # Flatten (B, N, F) -> (B, N*F) through a lane-dense VMEM scratch slab (static
    # lane-offset stores), then ONE K = N*F matmul instead of N tiny MXU push/pops.
    hn3 = hn.reshape(B, N, F)             # leading-dim split: layout-free
    for n in range(N):                    # static unroll over the (small) node count
        flat_ref[:, n * F:(n + 1) * F] = hn3[:, n, :]
    out_ref[...] = (jnp.dot(flat_ref[...], wlin_ref[...],
                            preferred_element_type=jnp.float32) + blin)        # (B, C)


def gcn_forward(adj_norm, x, params):
    B, N, F = x.shape
    C = params["wlin_t"].shape[1]
    assert C <= F, "bias packing assumes num_classes <= number_features"

    # ---- Wrapper-side (XLA, traced once) preprocessing ----
    # Block-diagonal normalized adjacency: (B, N, N) -> (B*N, B*N).
    eye_b = jnp.eye(B, dtype=adj_norm.dtype)
    adj_bd = (eye_b[:, None, :, None] * adj_norm[:, :, None, :]).reshape(B * N, B * N)
    x_flat = x.reshape(B * N, F)

    # Pack the two conv weights into one (2F, F) slab.
    w_packed = jnp.concatenate([params["w1"], params["w2"]], axis=0)

    # Fold the BatchNorm affine (gamma, beta) exactly into the Linear:
    #   out = ((h - mean) * rsqrt(var+eps) * gamma + beta).flatten @ Wlin + blin
    #       = (h - mean)*rsqrt(var+eps) .flatten @ (Wlin * gamma_rows) + (beta_rows @ Wlin + blin)
    gamma_rows = jnp.tile(params["gamma"].reshape(-1), N)          # (N*F,) index n*F+f -> gamma[f]
    beta_rows = jnp.tile(params["beta"].reshape(-1), N)            # (N*F,)
    wlin_folded = params["wlin_t"] * gamma_rows[:, None]           # (N*F, C)
    blin_folded = params["blin"] + beta_rows[None, :] @ params["wlin_t"]   # (1, C)

    # Pack b1, b2 and the (padded) folded linear bias into one (3, F) array.
    blin_pad = jnp.zeros((1, F), jnp.float32).at[:, :C].set(blin_folded)
    bias_packed = jnp.concatenate([params["b1"], params["b2"], blin_pad], axis=0)   # (3, F)

    # Advisory cost estimate so XLA can overlap this short, latency-bound call.
    flops = 2 * (2 * (B * N) * (B * N) * F + 2 * (B * N) * F * F) + 2 * B * (N * F) * C
    bytes_accessed = 4 * (adj_bd.size + x_flat.size + w_packed.size
                          + bias_packed.size + wlin_folded.size + B * C)

    vmem_spec = pl.BlockSpec(memory_space=pltpu.MemorySpace.VMEM)
    return pl.pallas_call(
        gcn_fused_kernel,
        out_shape=jax.ShapeDtypeStruct((B, C), jnp.float32),
        in_specs=[vmem_spec] * 5,
        out_specs=vmem_spec,
        scratch_shapes=[pltpu.VMEM((B, N * F), jnp.float32)],
        cost_estimate=pl.CostEstimate(flops=flops, transcendentals=F,
                                      bytes_accessed=bytes_accessed),
    )(adj_bd, x_flat, w_packed, bias_packed, wlin_folded)


def reference_forward(adj_norm, x, params):
    agg1 = jnp.einsum("bij,bjf->bif", adj_norm, x)
    h1 = jnp.maximum(agg1 @ params["w1"] + params["b1"], 0.0)
    agg2 = jnp.einsum("bij,bjf->bif", adj_norm, h1)
    h2 = agg2 @ params["w2"] + params["b2"]
    mean = h2.mean(axis=(0, 1), keepdims=True)
    var = ((h2 - mean) ** 2).mean(axis=(0, 1), keepdims=True)
    hn = (h2 - mean) / jnp.sqrt(var + 1e-5) * params["gamma"] + params["beta"]
    flat = hn.reshape(h2.shape[0], -1)
    return flat @ params["wlin_t"] + params["blin"]


if __name__ == "__main__":
    B, N, F, C = 4, 8, 16, 3   # batch_size, number_nodes, number_features, num_classes

    key = jax.random.PRNGKey(0)
    k_adj, k_x, k_w1, k_b1, k_w2, k_b2, k_wl, k_bl = jax.random.split(key, 8)

    # Random symmetric graphs with self-loops (no zero in-degree).
    A = (jax.random.uniform(k_adj, (B, N, N)) > 0.6).astype(jnp.float32)
    A = jnp.maximum(A, jnp.transpose(A, (0, 2, 1)))
    A = jnp.maximum(A, jnp.eye(N, dtype=jnp.float32)[None])
    deg = A.sum(-1)
    dinv = 1.0 / jnp.sqrt(deg)
    adj_norm = A * dinv[:, :, None] * dinv[:, None, :]        # D^-1/2 A D^-1/2

    x = jax.random.normal(k_x, (B, N, F), dtype=jnp.float32)  # graph.ndata['feature']

    params = {
        "w1": jax.random.normal(k_w1, (F, F), dtype=jnp.float32) * 0.2,
        "b1": jax.random.normal(k_b1, (1, F), dtype=jnp.float32) * 0.1,
        "w2": jax.random.normal(k_w2, (F, F), dtype=jnp.float32) * 0.2,
        "b2": jax.random.normal(k_b2, (1, F), dtype=jnp.float32) * 0.1,
        "gamma": jnp.ones((1, F), dtype=jnp.float32),
        "beta": jnp.zeros((1, F), dtype=jnp.float32),
        # nn.Linear(F*N, C): torch weight is (C, N*F); we pass the transpose (N*F, C),
        # row index = n*F + f (matches torch .reshape(B, -1) flatten order).
        "wlin_t": jax.random.normal(k_wl, (N * F, C), dtype=jnp.float32) * 0.05,
        "blin": jax.random.normal(k_bl, (1, C), dtype=jnp.float32) * 0.1,
    }

    out = gcn_forward(adj_norm, x, params)
    out = jax.block_until_ready(out)

    ref = reference_forward(adj_norm, x, params)
    assert out.shape == (B, C)
    assert jnp.allclose(out, ref, atol=5e-4, rtol=5e-4), "mismatch vs pure-JAX reference"

    print("KERNEL_OK")
</pallas_src>

<mosaic_0001>
module attributes {stable_mosaic.version = 11 : i64} {
  func.func @gcn_fused_kernel(%arg0: memref<32x32xf32, #tpu.memory_space<vmem>>, %arg1: memref<32x16xf32, #tpu.memory_space<vmem>>, %arg2: memref<32x16xf32, #tpu.memory_space<vmem>>, %arg3: memref<3x16xf32, #tpu.memory_space<vmem>>, %arg4: memref<128x3xf32, #tpu.memory_space<vmem>>, %arg5: memref<4x3xf32, #tpu.memory_space<vmem>>, %arg6: memref<4x128xf32, #tpu.memory_space<vmem>>) attributes {dimension_semantics = [], scalar_prefetch = 0 : i64, scratch_operands = 1 : i64, tpu.core_type = #tpu.core_type<tc>} {
    %c0 = arith.constant 0 : index
    %c0_0 = arith.constant 0 : index
    %0 = vector.load %arg0[%c0, %c0_0] : memref<32x32xf32, #tpu.memory_space<vmem>>, vector<32x32xf32>
    %c0_1 = arith.constant 0 : index
    %c0_2 = arith.constant 0 : index
    %1 = vector.load %arg3[%c0_1, %c0_2] : memref<3x16xf32, #tpu.memory_space<vmem>>, vector<3x16xf32>
    %c0_3 = arith.constant 0 : index
    %c0_4 = arith.constant 0 : index
    %2 = vector.load %arg2[%c0_3, %c0_4] : memref<32x16xf32, #tpu.memory_space<vmem>>, vector<16x16xf32>
    %c16 = arith.constant 16 : index
    %c0_5 = arith.constant 0 : index
    %3 = vector.load %arg2[%c16, %c0_5] : memref<32x16xf32, #tpu.memory_space<vmem>>, vector<16x16xf32>
    %4 = vector.extract_strided_slice %1 {offsets = [0, 0], sizes = [1, 16], strides = [1, 1]} : vector<3x16xf32> to vector<1x16xf32>
    %5 = vector.extract_strided_slice %1 {offsets = [1, 0], sizes = [1, 16], strides = [1, 1]} : vector<3x16xf32> to vector<1x16xf32>
    %6 = vector.extract_strided_slice %1 {offsets = [2, 0], sizes = [1, 3], strides = [1, 1]} : vector<3x16xf32> to vector<1x3xf32>
    %c0_6 = arith.constant 0 : index
    %c0_7 = arith.constant 0 : index
    %7 = vector.load %arg1[%c0_6, %c0_7] : memref<32x16xf32, #tpu.memory_space<vmem>>, vector<32x16xf32>
    %cst = arith.constant dense<0.000000e+00> : vector<32x16xf32>
    %8 = tpu.matmul %0, %7, %cst {dimension_numbers = #tpu.dot_dimension_numbers<[1], [0], [0], [1], [0, 0, 1, 1], [], []>} : vector<32x32xf32>, vector<32x16xf32>, vector<32x16xf32> -> vector<32x16xf32>
    %cst_8 = arith.constant dense<0.000000e+00> : vector<32x16xf32>
    %9 = tpu.matmul %8, %2, %cst_8 {dimension_numbers = #tpu.dot_dimension_numbers<[1], [0], [0], [1], [0, 0, 1, 1], [], []>} : vector<32x16xf32>, vector<16x16xf32>, vector<32x16xf32> -> vector<32x16xf32>
    %10 = vector.broadcast %4 : vector<1x16xf32> to vector<32x16xf32>
    %11 = arith.addf %9, %10 : vector<32x16xf32>
    %cst_9 = arith.constant 0.000000e+00 : f32
    %12 = vector.broadcast %cst_9 : f32 to vector<32x16xf32>
    %13 = arith.maximumf %11, %12 : vector<32x16xf32>
    %cst_10 = arith.constant dense<0.000000e+00> : vector<32x16xf32>
    %14 = tpu.matmul %0, %13, %cst_10 {dimension_numbers = #tpu.dot_dimension_numbers<[1], [0], [0], [1], [0, 0, 1, 1], [], []>} : vector<32x32xf32>, vector<32x16xf32>, vector<32x16xf32> -> vector<32x16xf32>
    %cst_11 = arith.constant dense<0.000000e+00> : vector<32x16xf32>
    %15 = tpu.matmul %14, %3, %cst_11 {dimension_numbers = #tpu.dot_dimension_numbers<[1], [0], [0], [1], [0, 0, 1, 1], [], []>} : vector<32x16xf32>, vector<16x16xf32>, vector<32x16xf32> -> vector<32x16xf32>
    %16 = vector.broadcast %5 : vector<1x16xf32> to vector<32x16xf32>
    %17 = arith.addf %15, %16 : vector<32x16xf32>
    %cst_12 = arith.constant dense<0.000000e+00> : vector<16xf32>
    %18 = vector.multi_reduction <add>, %17, %cst_12 [0] : vector<32x16xf32> to vector<16xf32>
    %19 = vector.shape_cast %18 : vector<16xf32> to vector<1x16xf32>
    %cst_13 = arith.constant 3.125000e-02 : f32
    %20 = vector.broadcast %cst_13 : f32 to vector<1x16xf32>
    %21 = arith.mulf %19, %20 : vector<1x16xf32>
    %22 = arith.mulf %17, %17 : vector<32x16xf32>
    %cst_14 = arith.constant dense<0.000000e+00> : vector<16xf32>
    %23 = vector.multi_reduction <add>, %22, %cst_14 [0] : vector<32x16xf32> to vector<16xf32>
    %24 = vector.shape_cast %23 : vector<16xf32> to vector<1x16xf32>
    %cst_15 = arith.constant 3.125000e-02 : f32
    %25 = vector.broadcast %cst_15 : f32 to vector<1x16xf32>
    %26 = arith.mulf %24, %25 : vector<1x16xf32>
    %27 = arith.mulf %21, %21 : vector<1x16xf32>
    %28 = arith.subf %26, %27 : vector<1x16xf32>
    %29 = vector.broadcast %21 : vector<1x16xf32> to vector<32x16xf32>
    %30 = arith.subf %17, %29 : vector<32x16xf32>
    %cst_16 = arith.constant 9.99999974E-6 : f32
    %31 = vector.broadcast %cst_16 : f32 to vector<1x16xf32>
    %32 = arith.addf %28, %31 : vector<1x16xf32>
    %33 = math.rsqrt %32 : vector<1x16xf32>
    %34 = vector.broadcast %33 : vector<1x16xf32> to vector<32x16xf32>
    %35 = arith.mulf %30, %34 : vector<32x16xf32>
    %36 = vector.shape_cast %35 : vector<32x16xf32> to vector<4x8x16xf32>
    %37 = vector.extract_strided_slice %36 {offsets = [0, 0, 0], sizes = [4, 1, 16], strides = [1, 1, 1]} : vector<4x8x16xf32> to vector<4x1x16xf32>
    %38 = vector.shape_cast %37 : vector<4x1x16xf32> to vector<4x16xf32>
    %c0_17 = arith.constant 0 : index
    %c0_18 = arith.constant 0 : index
    %39 = vector.load %arg6[%c0_17, %c0_18] : memref<4x128xf32, #tpu.memory_space<vmem>>, vector<4x16xf32>
    tpu.vector_store %arg6[%c0_17, %c0_18], %38 {strides = array<i32>} : memref<4x128xf32, #tpu.memory_space<vmem>>, vector<4x16xf32>,
    %40 = vector.extract_strided_slice %36 {offsets = [0, 1, 0], sizes = [4, 1, 16], strides = [1, 1, 1]} : vector<4x8x16xf32> to vector<4x1x16xf32>
    %41 = vector.shape_cast %40 : vector<4x1x16xf32> to vector<4x16xf32>
    %c0_19 = arith.constant 0 : index
    %c16_20 = arith.constant 16 : index
    %42 = vector.load %arg6[%c0_19, %c16_20] : memref<4x128xf32, #tpu.memory_space<vmem>>, vector<4x16xf32>
    tpu.vector_store %arg6[%c0_19, %c16_20], %41 {strides = array<i32>} : memref<4x128xf32, #tpu.memory_space<vmem>>, vector<4x16xf32>,
    %43 = vector.extract_strided_slice %36 {offsets = [0, 2, 0], sizes = [4, 1, 16], strides = [1, 1, 1]} : vector<4x8x16xf32> to vector<4x1x16xf32>
    %44 = vector.shape_cast %43 : vector<4x1x16xf32> to vector<4x16xf32>
    %c0_21 = arith.constant 0 : index
    %c32 = arith.constant 32 : index
    %45 = vector.load %arg6[%c0_21, %c32] : memref<4x128xf32, #tpu.memory_space<vmem>>, vector<4x16xf32>
    tpu.vector_store %arg6[%c0_21, %c32], %44 {strides = array<i32>} : memref<4x128xf32, #tpu.memory_space<vmem>>, vector<4x16xf32>,
    %46 = vector.extract_strided_slice %36 {offsets = [0, 3, 0], sizes = [4, 1, 16], strides = [1, 1, 1]} : vector<4x8x16xf32> to vector<4x1x16xf32>
    %47 = vector.shape_cast %46 : vector<4x1x16xf32> to vector<4x16xf32>
    %c0_22 = arith.constant 0 : index
    %c48 = arith.constant 48 : index
    %48 = vector.load %arg6[%c0_22, %c48] : memref<4x128xf32, #tpu.memory_space<vmem>>, vector<4x16xf32>
    tpu.vector_store %arg6[%c0_22, %c48], %47 {strides = array<i32>} : memref<4x128xf32, #tpu.memory_space<vmem>>, vector<4x16xf32>,
    %49 = vector.extract_strided_slice %36 {offsets = [0, 4, 0], sizes = [4, 1, 16], strides = [1, 1, 1]} : vector<4x8x16xf32> to vector<4x1x16xf32>
    %50 = vector.shape_cast %49 : vector<4x1x16xf32> to vector<4x16xf32>
    %c0_23 = arith.constant 0 : index
    %c64 = arith.constant 64 : index
    %51 = vector.load %arg6[%c0_23, %c64] : memref<4x128xf32, #tpu.memory_space<vmem>>, vector<4x16xf32>
    tpu.vector_store %arg6[%c0_23, %c64], %50 {strides = array<i32>} : memref<4x128xf32, #tpu.memory_space<vmem>>, vector<4x16xf32>,
    %52 = vector.extract_strided_slice %36 {offsets = [0, 5, 0], sizes = [4, 1, 16], strides = [1, 1, 1]} : vector<4x8x16xf32> to vector<4x1x16xf32>
    %53 = vector.shape_cast %52 : vector<4x1x16xf32> to vector<4x16xf32>
    %c0_24 = arith.constant 0 : index
    %c80 = arith.constant 80 : index
    %54 = vector.load %arg6[%c0_24, %c80] : memref<4x128xf32, #tpu.memory_space<vmem>>, vector<4x16xf32>
    tpu.vector_store %arg6[%c0_24, %c80], %53 {strides = array<i32>} : memref<4x128xf32, #tpu.memory_space<vmem>>, vector<4x16xf32>,
    %55 = vector.extract_strided_slice %36 {offsets = [0, 6, 0], sizes = [4, 1, 16], strides = [1, 1, 1]} : vector<4x8x16xf32> to vector<4x1x16xf32>
    %56 = vector.shape_cast %55 : vector<4x1x16xf32> to vector<4x16xf32>
    %c0_25 = arith.constant 0 : index
    %c96 = arith.constant 96 : index
    %57 = vector.load %arg6[%c0_25, %c96] : memref<4x128xf32, #tpu.memory_space<vmem>>, vector<4x16xf32>
    tpu.vector_store %arg6[%c0_25, %c96], %56 {strides = array<i32>} : memref<4x128xf32, #tpu.memory_space<vmem>>, vector<4x16xf32>,
    %58 = vector.extract_strided_slice %36 {offsets = [0, 7, 0], sizes = [4, 1, 16], strides = [1, 1, 1]} : vector<4x8x16xf32> to vector<4x1x16xf32>
    %59 = vector.shape_cast %58 : vector<4x1x16xf32> to vector<4x16xf32>
    %c0_26 = arith.constant 0 : index
    %c112 = arith.constant 112 : index
    %60 = vector.load %arg6[%c0_26, %c112] : memref<4x128xf32, #tpu.memory_space<vmem>>, vector<4x16xf32>
    tpu.vector_store %arg6[%c0_26, %c112], %59 {strides = array<i32>} : memref<4x128xf32, #tpu.memory_space<vmem>>, vector<4x16xf32>,
    %c0_27 = arith.constant 0 : index
    %c0_28 = arith.constant 0 : index
    %61 = vector.load %arg6[%c0_27, %c0_28] : memref<4x128xf32, #tpu.memory_space<vmem>>, vector<4x128xf32>
    %c0_29 = arith.constant 0 : index
    %c0_30 = arith.constant 0 : index
    %62 = vector.load %arg4[%c0_29, %c0_30] : memref<128x3xf32, #tpu.memory_space<vmem>>, vector<128x3xf32>
    %cst_31 = arith.constant dense<0.000000e+00> : vector<4x3xf32>
    %63 = tpu.matmul %61, %62, %cst_31 {dimension_numbers = #tpu.dot_dimension_numbers<[1], [0], [0], [1], [0, 0, 1, 1], [], []>} : vector<4x128xf32>, vector<128x3xf32>, vector<4x3xf32> -> vector<4x3xf32>
    %64 = vector.broadcast %6 : vector<1x3xf32> to vector<4x3xf32>
    %65 = arith.addf %63, %64 : vector<4x3xf32>
    %c0_32 = arith.constant 0 : index
    %c0_33 = arith.constant 0 : index
    %66 = vector.load %arg5[%c0_32, %c0_33] : memref<4x3xf32, #tpu.memory_space<vmem>>, vector<4x3xf32>
    tpu.vector_store %arg5[%c0_32, %c0_33], %65 {strides = array<i32>} : memref<4x3xf32, #tpu.memory_space<vmem>>, vector<4x3xf32>,
    return
  }
}

</mosaic_0001>

<bundles_post_ra>
// kernel: tpu_custom_call.1
= control target key start
LH: loop header
LB: loop body
LE: loop exit
PB: predicated region body
PF: predicated region fallthrough
CT: control target
= control target key end

     0   :  { %vm34_vm0 = vcmask 261120   ;;  %s1106_s0 = inlined_call_operand.vmem [shape: f32[32,32], index: 0, kind: input, shape index: {}]   ;;  %s1107_s1 = inlined_call_operand.vmem [shape: f32[32,16], index: 1, kind: input, shape index: {}]   ;;  %s1108_s2 = inlined_call_operand.vmem [shape: f32[32,16], index: 2, kind: input, shape index: {}]   ;;  %s1109_s3 = inlined_call_operand.vmem [shape: f32[3,16], index: 3, kind: input, shape index: {}]   ;;  %s1110_s4 = inlined_call_operand.vmem [shape: f32[128,3], index: 4, kind: input, shape index: {}]   ;;  %s1111_s5 = inlined_call_operand.hbm [shape: f32[4,3], index: 5, kind: output, shape index: {}]  }
   0x1   :  { %v30_v0 = vld [vmem:[%s1107_s1] sm:$0xff]  ;;  %v31_v1 = vld [vmem:[%s1107_s1 + $0x8] sm:$0xff]  ;;  %v32_v2 = vld [vmem:[%s1107_s1 + $0x10] sm:$0xff] }
   0x2   :  { %v807_v3 = vpack.c.bf16 %v31_v1, %v30_v0  ;;  %v33_v4 = vld [vmem:[%s1107_s1 + $0x18] sm:$0xff]  ;;  %v21_v5 = vld [vmem:[%s1106_s0] sm:$0xff]  ;;  %v27_v8 = vld [vmem:[%s1108_s2 + $0x8] sm:$0xff] }
   0x3   :  { %v811_v6 = vpack.c.bf16 %v33_v4, %v32_v2  ;;  %732 = vmatprep.mubr.msk.f32.mxu0 %vm34_vm0, %v21_v5  ;;  %v26_v7 = vld [vmem:[%s1108_s2] sm:$0xff] }
   0x4   :  { %808 = vmatprep.subr.bf16.mxu0 %v807_v3 }
   0x5   :  { %10 = vsyncpa [#allocation4], 0  ;;  %810 = vmatpush3.bf16.msra.mxu0 %v807_v3  ;;  %v815_v9 = vpack.c.bf16 %v27_v8, %v26_v7  ;;  %v22_v10 = vld [vmem:[%s1106_s0 + $0x8] sm:$0xff]  ;;  %v23_v11 = vld [vmem:[%s1106_s0 + $0x10] sm:$0xff]  ;;  %vm136_vm1 = vcmask 130048   ;;  %v132_v17 = vlaneseq  ;;  %v892_v46 = vmov 0.0|0.0  }
   0x6   :  { %812 = vmatprep.subr.bf16.mxu0 %v811_v6  ;;  %v24_v12 = vld [vmem:[%s1106_s0 + $0x18] sm:$0xff]  ;;  %v978_v20 = vld [vmem:[%s1109_s3] sm:$0x7]  ;;  %v28_v34 = vld [vmem:[%s1108_s2 + $0x10] sm:$0xff]  ;;  %vm504_vm2 = vcmask 1046534   ;;  %vm513_vm3 = vcmask 1047559  }
   0x7   :  { %816 = vmatprep.subr.bf16.mxu1 %v815_v9  ;;  %v972_v18 = vshrl.u32 %v132_v17, 7  ;;  %v29_v35 = vld [vmem:[%s1108_s2 + $0x18] sm:$0xff]  ;;  %v557_v43 = vld [vmem:[%s1110_s4] sm:$0xff]  ;;  %v558_v44 = vld [vmem:[%s1110_s4 + $0x8] sm:$0xff]  ;;  %vm473_vm4 = vcmask 1041409   ;;  %vm476_vm5 = vcmask 1042434  }
   0x8   :  { %818 = vmatpush3.bf16.msra.mxu1 %v815_v9  ;;  %v827_v38 = vpack.c.bf16 %v29_v35, %v28_v34  ;;  %v559_v45 = vld [vmem:[%s1110_s4 + $0x10] sm:$0xff]  ;;  %v832_v47 = vpack.c.bf16 %v558_v44, %v557_v43  ;;  %v560_v48 = vld [vmem:[%s1110_s4 + $0x18] sm:$0xff]  ;;  %vm479_vm6 = vcmask 1043459   ;;  %vm486_vm7 = vcmask 1044484   ;;  %s893_s9 = smov 80   ;;  %s894_s13 = smov 96  }
   0x9   :  { %814 = vmatpush3.bf16.msra.mxu0 %v811_v6  ;;  %v134_v19 = vsub.s32 0, %v972_v18  ;;  %831 = vmatprep.subr.bf16.mxu1 %v892_v46  ;;  %v835_v49 = vpack.c.bf16 %v560_v48, %v559_v45  ;;  %v325_v50 = vsub.s32 1, %v972_v18  ;;  %vm495_vm8 = vcmask 1045509   ;;  %s895_s16 = smov 16   ;;  %s896_s17 = smov 48  }
   0xa   :  { %vm482_vm9 = vcmask 125952   ;;  %vm897_vm10 = vmmov 0   ;;  %s899_s22 = smov 32   ;;  %s900_s23 = smov 64   ;;  %vm491_vm11 = vcmask 258177   ;;  %vm500_vm12 = vcmask 390402  }
   0xb   :  { %v135_v21 = vrot.slane %v978_v20, %v134_v19  ;;  %v326_v51 = vrot.slane %v978_v20, %v325_v50  ;;  %v566_v50 = vld [vmem:[%s1110_s4 + $0x48] sm:$0xff]  ;;  %s901_s24 = smov 112   ;;  %vm509_vm13 = vcmask 522627   ;;  %vm518_vm14 = vcmask 654852  }
   0xc   :  { %733 = vmatmul.mubr.msk.f32.vlgmr.msra.gmra.mrb[0].mxu0 %vm34_vm0, %v22_v10  ;;  %vm530_vm15 = vcmask 778880  }
   0xd   :  { %735 = vmatprep.mubr.msk.f32.mxu0 %vm34_vm0, %v23_v11 }
  0x10   :  { %736 = vmatmul.mubr.msk.f32.gmra.mrb[2].mxu0 %vm34_vm0, %v24_v12 }
  0x11   :  { %756 = vmatprep.mubr.msk.f32.mxu0 %vm34_vm0, %v21_v5 }
  0xdf   :  { %v734_v13 = vpop.f32.mrb[0].mxu0 }
  0xe0   :  { %v113_v14 = vpop.f32.mrb[1].mxu0 }
  0xe1   :  { %742 = vmatprep.mubr.msk.f32.mxu1 %vm136_vm1, %v113_v14 }
  0xe2   :  { %743 = vmatmul.mubr.msk.f32.vlgmr.msra.gmra.mrb[0].mxu1 %vm136_vm1, %v734_v13 }
  0xe3   :  { %v737_v15 = vpop.f32.mrb[2].mxu0  ;;  %833 = vmatpush3.bf16.msra.mxu1 %v832_v47 }
  0xe4   :  { %v123_v16 = vpop.f32.mrb[3].mxu0  ;;  %834 = vmatprep.subr.bf16.mxu1 %v892_v46 }
  0xe5   :  { %745 = vmatprep.mubr.msk.f32.mxu1 %vm136_vm1, %v123_v16 }
  0xe6   :  { %746 = vmatmul.mubr.msk.f32.gmra.mrb[2].mxu1 %vm136_vm1, %v737_v15 }
  0xe7   :  { %836 = vmatpush3.bf16.msra.mxu1 %v835_v49  ;;  %v565_v49 = vld [vmem:[%s1110_s4 + $0x40] sm:$0xff] }
  0xe8   :  { %837 = vmatprep.subr.bf16.mxu1 %v892_v46 }
 0x1b5   :  { %v744_v22 = vpop.f32.mrb[0].mxu1 }
 0x1b6   :  { %v221_v23 = vadd.f32 %v744_v22, %v135_v21  ;;  %v215_v24 = vpop.f32.mrb[1].mxu1 }
 0x1b7   :  { %v216_v25 = vadd.f32 %v215_v24, %v135_v21 }
 0x1b8   :  { %v235_v26 = vmax.f32 %v221_v23, 0.0 }
 0x1b9   :  { %v234_v27 = vmax.f32 %v216_v25, 0.0  ;;  %v747_v28 = vpop.f32.mrb[2].mxu1 }
 0x1ba   :  { %v231_v29 = vadd.f32 %v747_v28, %v135_v21  ;;  %v225_v30 = vpop.f32.mrb[3].mxu1 }
 0x1bb   :  { %v819_v31 = vpack.c.bf16 %v235_v26, %v234_v27  ;;  %v226_v32 = vadd.f32 %v225_v30, %v135_v21 }
 0x1bc   :  { %v237_v33 = vmax.f32 %v231_v29, 0.0 }
 0x1bd   :  { %v236_v36 = vmax.f32 %v226_v32, 0.0  ;;  %820 = vmatprep.subr.bf16.mxu0 %v819_v31 }
 0x1be   :  { %822 = vmatpush3.bf16.msra.mxu0 %v819_v31 }
 0x1bf   :  { %v823_v37 = vpack.c.bf16 %v237_v33, %v236_v36 }
 0x1c1   :  { %824 = vmatprep.subr.bf16.mxu0 %v823_v37 }
 0x1c2   :  { %826 = vmatpush3.bf16.msra.mxu0 %v823_v37  ;;  %v561_v37 = vld [vmem:[%s1110_s4 + $0x20] sm:$0xff] }
 0x1c3   :  { %828 = vmatprep.subr.bf16.mxu0 %v827_v38 }
 0x1c5   :  { %757 = vmatmul.mubr.msk.f32.vlgmr.msra.gmra.mrb[4].mxu0 %vm34_vm0, %v22_v10 }
 0x1c6   :  { %759 = vmatprep.mubr.msk.f32.mxu0 %vm34_vm0, %v23_v11  ;;  %830 = vmatpush3.bf16.msra.mxu0 %v827_v38  ;;  %v562_v38 = vld [vmem:[%s1110_s4 + $0x28] sm:$0xff] }
 0x1c9   :  { %760 = vmatmul.mubr.msk.f32.gmra.mrb[6].mxu0 %vm34_vm0, %v24_v12  ;;  %vm528_vm0 = vcmask 786053  }
 0x298   :  { %v758_v39 = vpop.f32.mrb[4].mxu0 }
 0x299   :  { %v304_v40 = vpop.f32.mrb[5].mxu0 }
 0x29a   :  { %766 = vmatprep.mubr.msk.f32.mxu0 %vm136_vm1, %v304_v40  ;;  %v563_v40 = vld [vmem:[%s1110_s4 + $0x30] sm:$0xff] }
 0x29b   :  { %767 = vmatmul.mubr.msk.f32.vlgmr.msra.gmra.mrb[8].mxu0 %vm136_vm1, %v758_v39  ;;  %v838_v39 = vpack.c.bf16 %v562_v38, %v561_v37 }
 0x29c   :  { %v761_v41 = vpop.f32.mrb[6].mxu0 }
 0x29d   :  { %v314_v42 = vpop.f32.mrb[7].mxu0  ;;  %839 = vmatpush3.bf16.msra.mxu1 %v838_v39 }
 0x29e   :  { %769 = vmatprep.mubr.msk.f32.mxu0 %vm136_vm1, %v314_v42  ;;  %840 = vmatprep.subr.bf16.mxu1 %v892_v46 }
 0x29f   :  { %770 = vmatmul.mubr.msk.f32.gmra.mrb[10].mxu0 %vm136_vm1, %v761_v41  ;;  %v564_v41 = vld [vmem:[%s1110_s4 + $0x38] sm:$0xff] }
 0x2a0   :  { %v841_v42 = vpack.c.bf16 %v564_v41, %v563_v40 }
 0x2a2   :  { %842 = vmatpush3.bf16.msra.mxu1 %v841_v42 }
 0x2a3   :  { %843 = vmatprep.subr.bf16.mxu1 %v892_v46 }
 0x36e   :  { %v768_v52 = vpop.f32.mrb[8].mxu0 }
 0x36f   :  { %v411_v53 = vadd.f32 %v768_v52, %v326_v51  ;;  %v405_v54 = vpop.f32.mrb[9].mxu0 }
 0x370   :  { %v406_v55 = vadd.f32 %v405_v54, %v326_v51  ;;  %v844_v54 = vpack.c.bf16 %v566_v50, %v565_v49 }
 0x371   :  { %v425_v56 = vsel %vm136_vm1, %v411_v53, 0.0  ;;  %v439_v57 = vmul.f32 %v411_v53, %v411_v53 }
 0x372   :  { %v424_v58 = vsel %vm136_vm1, %v406_v55, 0.0  ;;  %v438_v59 = vmul.f32 %v406_v55, %v406_v55  ;;  %v771_v60 = vpop.f32.mrb[10].mxu0  ;;  %845 = vmatpush3.bf16.msra.mxu1 %v844_v54 }
 0x373   :  { %v443_v61 = vsel %vm136_vm1, %v439_v57, 0.0  ;;  %v426_v62 = vadd.f32 %v425_v56, %v424_v58  ;;  %v421_v63 = vadd.f32 %v771_v60, %v326_v51  ;;  %v415_v0 = vpop.f32.mrb[11].mxu0  ;;  %846 = vmatprep.subr.bf16.mxu1 %v892_v46 }
 0x374   :  { %v442_v1 = vsel %vm136_vm1, %v438_v59, 0.0  ;;  %v416_v2 = vadd.f32 %v415_v0, %v326_v51 }
 0x375   :  { %v444_v3 = vadd.f32 %v443_v61, %v442_v1  ;;  %v441_v4 = vmul.f32 %v421_v63, %v421_v63  ;;  %v429_v8 = vsel %vm136_vm1, %v421_v63, 0.0 }
 0x376   :  { %v427_v5 = vsel %vm136_vm1, %v416_v2, 0.0  ;;  %v440_v6 = vmul.f32 %v416_v2, %v416_v2 }
 0x377   :  { %v428_v7 = vadd.f32 %v427_v5, %v426_v62  ;;  %v447_v12 = vsel %vm136_vm1, %v441_v4, 0.0  ;;  %v568_v4 = vld [vmem:[%s1110_s4 + $0x58] sm:$0xff] }
 0x378   :  { %v445_v9 = vsel %vm136_vm1, %v440_v6, 0.0  ;;  %vm540_vm1 = vcmask 917254  }
 0x379   :  { %v430_v10 = vadd.f32 %v429_v8, %v428_v7  ;;  %v446_v11 = vadd.f32 %v445_v9, %v444_v3  ;;  %v567_v3 = vld [vmem:[%s1110_s4 + $0x50] sm:$0xff] }
 0x37b   :  { %v431_v13 = vrot.slane %v430_v10, 4  ;;  %v448_v14 = vadd.f32 %v447_v12, %v446_v11 }
 0x37d   :  { %v432_v15 = vadd.f32 %v431_v13, %v430_v10  ;;  %v449_v16 = vrot.slane %v448_v14, 4 }
 0x37f   :  { %v433_v17 = vrot.slane %v432_v15, 2  ;;  %v450_v19 = vadd.f32 %v449_v16, %v448_v14  ;;  %v847_v14 = vpack.c.bf16 %v568_v4, %v567_v3  ;;  %v570_v16 = vld [vmem:[%s1110_s4 + $0x68] sm:$0xff] }
 0x381   :  { %v434_v21 = vadd.f32 %v433_v17, %v432_v15  ;;  %v451_v22 = vrot.slane %v450_v19, 2  ;;  %v569_v15 = vld [vmem:[%s1110_s4 + $0x60] sm:$0xff]  ;;  %848 = vmatpush3.bf16.msra.mxu1 %v847_v14 }
 0x382   :  { %v850_v17 = vpack.c.bf16 %v570_v16, %v569_v15  ;;  %849 = vmatprep.subr.bf16.mxu1 %v892_v46 }
 0x383   :  { %v435_v23 = vrot.slane %v434_v21, 1  ;;  %v452_v24 = vadd.f32 %v451_v22, %v450_v19  ;;  %v571_v19 = vld [vmem:[%s1110_s4 + $0x70] sm:$0xff]  ;;  %v898_v22 = vmov 0.0  }
 0x384   :  { %804 = vmatprep.mubr.msk.f32.mxu1 %vm897_vm10, %v898_v22 }
 0x385   :  { %v436_v25 = vadd.f32 %v435_v23, %v434_v21  ;;  %v453_v26 = vrot.slane %v452_v24, 1  ;;  %v572_v21 = vld [vmem:[%s1110_s4 + $0x78] sm:$0xff]  ;;  %851 = vmatpush3.bf16.msra.mxu1 %v850_v17  ;;  %s902_s4 = smov [#allocation3]  }
 0x386   :  { %v853_v23 = vpack.c.bf16 %v572_v21, %v571_v19  ;;  %852 = vmatprep.subr.bf16.mxu1 %v892_v46  ;;  %s655_s25 = sshll.u32 %s902_s4, 4  ;;  %s656_s25 = int_to_ptr.vmem [resolvable:$true] %s655_s25 }
 0x387   :  { %v437_v27 = vmul.f32 0.03125, %v436_v25  ;;  %v454_v28 = vadd.f32 %v453_v26, %v452_v24  ;;  %s868_s26 = scalar_lea.vmem %s656_s25, 64  ;;  %p873_p1 = scmp.lt.s32.totalorder %s656_s25, %s656_s25 }
 0x388   :  { %p869_p0 = scmp.ne.s32.totalorder %s656_s25, %s868_s26  ;;  %p874_p2 = scmp.lt.s32.totalorder %s868_s26, %s868_s26 }
 0x389   :  { %v455_v29 = vmul.f32 0.03125, %v454_v28  ;;  %v456_v30 = vmul.f32 %v437_v27, %v437_v27  ;;  %v458_v31 = vsub.f32 %v406_v55, %v437_v27  ;;  %v459_v32 = vsub.f32 %v411_v53, %v437_v27  ;;  %854 = vmatpush3.bf16.msra.mxu1 %v853_v23 }
 0x38a   :  { %v460_v33 = vsub.f32 %v416_v2, %v437_v27  ;;  %v461_v34 = vsub.f32 %v421_v63, %v437_v27  ;;  %p875_p3 = por %p874_p2, %p873_p1 }
 0x38b   :  { %v457_v35 = vsub.f32 %v455_v29, %v456_v30 }
 0x38c   :  { %p876_p4 = pnand %p875_p3, %p869_p0 }
 0x38d   :  { %v462_v36 = vadd.f32 1e-05, %v457_v35 }
 0x38f   :  { %866 = vrsqrt.f32 %v462_v36 }
 0x399   :  { %v867_v43 = vpop.eup %866 }
 0x39a   :  { %v1032_v44 = vmul.f32 %v867_v43, %v458_v31  ;;  %v465_v45 = vmul.f32 %v867_v43, %v459_v32  ;;  %v466_v47 = vmul.f32 %v867_v43, %v460_v33  ;;  %v467_v48 = vmul.f32 %v867_v43, %v461_v34 }
 0x39b   :  { %v575_v34 = vsub.s32 2, %v972_v18 }
 0x39c   :  { %v472_v51 = vrot.slane %v465_v45, 7  ;;  %v475_v52 = vrot.slane %v466_v47, 6  ;;  %v478_v53 = vrot.slane %v467_v48, 5 }
 0x39d   :  { %v576_v35 = vrot.slane %v978_v20, %v575_v34 }
 0x39e   :  { %524 = vrot.lane.b32.xlu1 %v478_v53, %s893_s9  ;;  %v520_v55 = vsel %vm504_vm2, %v472_v51, %v1032_v44  ;;  %v533_v56 = vsel %vm473_vm4, %v478_v53, %v475_v52  ;;  %v474_v57 = vsel %vm473_vm4, %v472_v51, %v1032_v44  ;;  %v484_v58 = vsel %vm476_vm5, %v472_v51, %v1032_v44 }
 0x39f   :  { %v521_v59 = vsel %vm513_vm3, %v475_v52, %v520_v55  ;;  %v485_v60 = vsel %vm479_vm6, %v475_v52, %v484_v58  ;;  %v502_v61 = vsel %vm486_vm7, %v472_v51, %v1032_v44  ;;  %v493_v62 = vsel %vm479_vm6, %v472_v51, %v1032_v44 }
 0x3a0   :  { %522 = vrot.lane.b32.xlu0 %v521_v59, %s893_s9  ;;  %v487_v63 = vsel %vm486_vm7, %v478_v53, %v485_v60  ;;  %v503_v0 = vsel %vm495_vm8, %v475_v52, %v502_v61  ;;  %v494_v1 = vsel %vm486_vm7, %v475_v52, %v493_v62  ;;  %v511_v2 = vsel %vm495_vm8, %v472_v51, %v1032_v44 }
 0x3a1   :  { %v505_v5 = vsel %vm504_vm2, %v478_v53, %v503_v0  ;;  %v496_v6 = vsel %vm495_vm8, %v478_v53, %v494_v1  ;;  %v512_v7 = vsel %vm504_vm2, %v475_v52, %v511_v2  ;;  %v532_v8 = vsel %vm513_vm3, %v472_v51, %v1032_v44 }
 0x3a2   :  { %536 = vrot.lane.b32.xlu1 %v533_v56, %s894_s13  ;;  %v514_v9 = vsel %vm513_vm3, %v478_v53, %v512_v7  ;;  %v544_v10 = vsel %vm473_vm4, %v475_v52, %v472_v51  ;;  %v477_v11 = vsel %vm476_vm5, %v475_v52, %v474_v57  ;;  %vm542_vm2 = vcmask 911104  }
 0x3a3   :  { %v545_v12 = vsel %vm476_vm5, %v478_v53, %v544_v10  ;;  %v480_v13 = vsel %vm479_vm6, %v478_v53, %v477_v11  ;;  %vm554_vm3 = vcmask 1043328   ;;  %vm552_vm4 = vcmask 1048455  }
 0x3a4   :  { %488 = vrot.lane.b32.xlu0 %v487_v63, %s895_s16  ;;  %483 = vst.msk [vmem:[#allocation2] sm:$0xf] %vm482_vm9, %v480_v13  ;;  %vm647_vm5 = vcmask 19456  }
 0x3a6   :  { %506 = vrot.lane.b32.xlu1 %v505_v5, %s896_s17 }
 0x3a8   :  { %497 = vrot.lane.b32.xlu0 %v496_v6, %s899_s22 }
 0x3aa   :  { %515 = vrot.lane.b32.xlu1 %v514_v9, %s900_s23 }
 0x3ac   :  { %534 = vrot.lane.b32.xlu0 %v532_v8, %s894_s13 }
 0x3ae   :  { %548 = vrot.lane.b32.xlu1 %v545_v12, %s901_s24 }
 0x3b0   :  { %546 = vrot.lane.b32.xlu0 %v1032_v44, %s901_s24 }
 0x410   :  { %v525_v24 = vpop.permute.xlu1 %524 }
 0x412   :  { %v523_v25 = vpop.permute.xlu0 %522 }
 0x414   :  { %v537_v26 = vpop.permute.xlu1 %536 }
 0x416   :  { %v489_v27 = vpop.permute.xlu0 %488 }
 0x417   :  { %492 = vst.msk [vmem:[#allocation2 - $0x1] sm:$0x1e] %vm491_vm11, %v489_v27 }
 0x418   :  { %v507_v28 = vpop.permute.xlu1 %506 }
 0x41a   :  { %v498_v29 = vpop.permute.xlu0 %497 }
 0x41b   :  { %501 = vst.msk [vmem:[#allocation2 - $0x2] sm:$0x3c] %vm500_vm12, %v498_v29 }
 0x41c   :  { %v516_v46 = vpop.permute.xlu1 %515  ;;  %510 = vst.msk [vmem:[#allocation2 - $0x3] sm:$0x78] %vm509_vm13, %v507_v28 }
 0x41d   :  { %519 = vst.msk [vmem:[#allocation2 - $0x4] sm:$0xf0] %vm518_vm14, %v516_v46 }
 0x41e   :  { %531 = vst.msk [vmem:[#allocation2 + $0x3] sm:$0x1] %vm530_vm15, %v525_v24  ;;  %v535_v30 = vpop.permute.xlu0 %534 }
 0x41f   :  { %529 = vst.msk [vmem:[#allocation2 - $0x5] sm:$0xe0] %vm528_vm0, %v523_v25 }
 0x420   :  { %541 = vst.msk [vmem:[#allocation2 - $0x6] sm:$0xc0] %vm540_vm1, %v535_v30  ;;  %v549_v31 = vpop.permute.xlu1 %548 }
 0x421   :  { %543 = vst.msk [vmem:[#allocation2 + $0x2] sm:$0x3] %vm542_vm2, %v537_v26 }
 0x422   :  { %555 = vst.msk [vmem:[#allocation2 + $0x1] sm:$0x7] %vm554_vm3, %v549_v31  ;;  %v547_v32 = vpop.permute.xlu0 %546 }
 0x423   :  { %553 = vst.msk [vmem:[#allocation2 - $0x7] sm:$0x80] %vm552_vm4, %v547_v32 }
 0x42a   :  { %v556_v33 = vld [vmem:[#allocation2] sm:$0xf] }
 0x42b   :  { %805 = vmatmul.mubr.f32.vlgmr.msra.gmra.mrb[4].mxu1 %v556_v33 }
 0x4fe   :  { %v643_v36 = vpop.f32.mrb[4].mxu1 }
 0x4ff   :  { %v644_v37 = vadd.f32 %v643_v36, %v576_v35  ;;  %v806_v38 = vpop.f32.mrb[5].mxu1 }
 0x501   :  { %648 = vst.msk [vmem:[#allocation3] sm:$0xf] %vm647_vm5, %v644_v37 }
 0x502   :  { %879 = shalt.err (!%p876_p4)
}
 0x503   :  { %s880_s29 = scalar_lea.hbm %s1111_s5, 64 }
 0x504   :  { %p881_p5 = scmp.ne.s32.totalorder %s1111_s5, %s880_s29  ;;  %p884_p6 = scmp.lt.u32.totalorder %s880_s29, %s1111_s5 }
 0x506   :  { %p886_p7 = pnand %p884_p6, %p881_p5 }
 0x508   :  { %889 = shalt.err (!%p886_p7)
}
 0x509   :  { %658 = dma.vmem_to_hbm [thread:$0]  %s656_s25, 64, %s1111_s5, [#allocation4]  }
 0x50a   :  { %890 = dma.done.wait [#allocation4], 64  }
 0x50b   :  { %891 = vsyncadd [#allocation4], 4294967232 }
 0x50c   :  { %662 = vsyncpa [#allocation4], 1 }

</bundles_post_ra>
